<compile_context>
chip_gen: v6e
topology: v6e:2x2x1
jax: 0.10.0
libtpu: 0.0.40
codegen_flags: <defaults>
</compile_context>

<pallas_src>
import functools

import jax
import jax.numpy as jnp
from jax.experimental import pallas as pl
from jax.experimental.pallas import tpu as pltpu

BN_EPS = 1e-5                      # nn.BatchNorm2d default
MAX_TILE_M = 256                   # per-tile M cap (multiple of 128); kept small so the
                                   # toy stem (M=512) exercises the tiled two-pass path.
VMEM_LIMIT = 32 * 1024 * 1024      # explicit scoped-VMEM limit (safe on v5e/v6e/v7x)


def _vmem_specs(n):
    return [pl.BlockSpec(memory_space=pltpu.MemorySpace.VMEM) for _ in range(n)]


def _pick_tile_m(m):
    """Largest multiple-of-128 divisor of m that is <= MAX_TILE_M; None => single block."""
    if m <= MAX_TILE_M:
        return None
    t = MAX_TILE_M - (MAX_TILE_M % 128)
    while t >= 128:
        if m % t == 0:
            return t
        t -= 128
    return None


# ----------------------------------------------------------------------------
# Pallas kernels
# ----------------------------------------------------------------------------
def _conv_fused_kernel(use_bn, relu, has_res, x_ref, w_ref, b_ref, *rest):
    """Single-block conv: bf16 MXU matmul + bias + [BN] + [residual] + [ReLU]."""
    rest = list(rest)
    g_ref = bt_ref = r_ref = None
    if use_bn:
        g_ref, bt_ref = rest.pop(0), rest.pop(0)
    if has_res:
        r_ref = rest.pop(0)
    o_ref = rest.pop(0)

    z = jnp.dot(w_ref[...], x_ref[...], preferred_element_type=jnp.float32)
    z = z + b_ref[...]                                       # (Cout, M) f32
    if use_bn:
        # Training-mode BatchNorm2d: batch statistics over (N, H, W) == axis 1.
        mean = jnp.mean(z, axis=1, keepdims=True)
        var = jnp.mean(jnp.square(z - mean), axis=1, keepdims=True)
        z = (z - mean) * jax.lax.rsqrt(var + BN_EPS) * g_ref[...] + bt_ref[...]
    if has_res:
        z = z + r_ref[...].astype(jnp.float32)
    if relu:
        z = jnp.maximum(z, 0.0)
    o_ref[...] = z.astype(o_ref.dtype)


def _conv_tile_kernel(with_stats, x_ref, w_ref, b_ref, z_ref, *stat_refs):
    """Tiled conv pass 1: bf16 matmul + bias; optional per-tile sum / sum-of-squares."""
    z = jnp.dot(w_ref[...], x_ref[...], preferred_element_type=jnp.float32)
    z = z + b_ref[...]                                       # (Cout, tile_M) f32
    z_ref[...] = z.astype(z_ref.dtype)
    if with_stats:
        sum_ref, sq_ref = stat_refs
        sum_ref[...] = jnp.sum(z, axis=1, keepdims=True)[None]     # (1, Cout, 1)
        sq_ref[...] = jnp.sum(z * z, axis=1, keepdims=True)[None]  # (1, Cout, 1)


def _affine_act_kernel(relu, has_res, z_ref, s_ref, t_ref, *rest):
    """Tiled conv pass 2: per-channel affine (folded BN) + [residual] + [ReLU]."""
    if has_res:
        r_ref, o_ref = rest
    else:
        (o_ref,) = rest
    y = z_ref[...] * s_ref[...] + t_ref[...]
    if has_res:
        y = y + r_ref[...].astype(jnp.float32)
    if relu:
        y = jnp.maximum(y, 0.0)
    o_ref[...] = y.astype(o_ref.dtype)


def _maxpool_kernel(n_win, x_ref, o_ref):
    # x: (n_win, R, 128) lane-dense window slabs -> elementwise max over window axis.
    y = x_ref[0]
    for i in range(1, n_win):
        y = jnp.maximum(y, x_ref[i])
    o_ref[...] = y


def _avgpool_kernel(hw, x_ref, o_ref):
    # x: (HW, B, C) -> mean over spatial axis, accumulated in f32.
    acc = x_ref[0].astype(jnp.float32)
    for i in range(1, hw):
        acc = acc + x_ref[i].astype(jnp.float32)
    o_ref[...] = acc * (1.0 / hw)


# ----------------------------------------------------------------------------
# im2col (channel-major, transposed) + fused conv wrapper
# ----------------------------------------------------------------------------
def _im2col_cm(x_cm, k, stride, pad):
    """(C, B, H, W) -> transposed patch matrix (kh*kw*C, B*Ho*Wo) in bf16."""
    C, B, H, W = x_cm.shape
    xp = jnp.pad(x_cm, ((0, 0), (0, 0), (pad, pad), (pad, pad)))
    Ho = (H + 2 * pad - k) // stride + 1
    Wo = (W + 2 * pad - k) // stride + 1
    cols = []
    for dh in range(k):
        for dw in range(k):
            cols.append(
                xp[:, :, dh:dh + Ho * stride:stride, dw:dw + Wo * stride:stride]
                .reshape(C, B * Ho * Wo))
    patches_t = jnp.stack(cols, axis=0).reshape(k * k * C, B * Ho * Wo)
    return patches_t.astype(jnp.bfloat16), Ho, Wo


def conv_bn_act(x_cm, w, b, gamma, beta, *, stride, pad, relu, use_bn,
                residual=None, out_dtype=jnp.bfloat16):
    """Conv2d(+bias) -> [train-mode BN] -> (+residual) -> [ReLU] on (C,B,H,W) input."""
    cout, cin, k, _ = w.shape
    _, B, _, _ = x_cm.shape
    patches_t, Ho, Wo = _im2col_cm(x_cm, k, stride, pad)           # (K, M) bf16
    K, M = patches_t.shape
    # PyTorch weight (Cout, Cin, kh, kw) -> (Cout, kh*kw*Cin) matching patch row order.
    w2d_t = jnp.transpose(w, (0, 2, 3, 1)).reshape(cout, K).astype(jnp.bfloat16)
    bias = b.reshape(cout, 1).astype(jnp.float32)
    has_res = residual is not None
    res = residual.reshape(cout, M) if has_res else None

    tile = _pick_tile_m(M)
    if tile is None:
        # Whole-M single block: one fully fused kernel, no unused operands DMA'd.
        inputs = [patches_t, w2d_t, bias]
        if use_bn:
            inputs += [gamma.reshape(cout, 1).astype(jnp.float32),
                       beta.reshape(cout, 1).astype(jnp.float32)]
        if has_res:
            inputs.append(res)
        y = pl.pallas_call(
            functools.partial(_conv_fused_kernel, use_bn, relu, has_res),
            out_shape=jax.ShapeDtypeStruct((cout, M), out_dtype),
            in_specs=_vmem_specs(len(inputs)),
            out_specs=pl.BlockSpec(memory_space=pltpu.MemorySpace.VMEM),
            compiler_params=pltpu.CompilerParams(vmem_limit_bytes=VMEM_LIMIT),
        )(*inputs)
        return y.reshape(cout, B, Ho, Wo)

    # Tiled two-pass path (large M): pass 1 = matmul (+ stats), pass 2 = affine/act.
    ntiles = M // tile
    needs_post = use_bn or relu or has_res
    z_dtype = jnp.float32 if needs_post else out_dtype
    in_specs = [pl.BlockSpec((K, tile), lambda i: (0, i)),
                pl.BlockSpec((cout, K), lambda i: (0, 0)),
                pl.BlockSpec((cout, 1), lambda i: (0, 0))]
    z_spec = pl.BlockSpec((cout, tile), lambda i: (0, i))
    cparams = pltpu.CompilerParams(dimension_semantics=("parallel",),
                                   vmem_limit_bytes=VMEM_LIMIT)

    if use_bn:
        stat_spec = pl.BlockSpec((1, cout, 1), lambda i: (i, 0, 0))
        z, ssum, ssq = pl.pallas_call(
            functools.partial(_conv_tile_kernel, True),
            out_shape=(jax.ShapeDtypeStruct((cout, M), z_dtype),
                       jax.ShapeDtypeStruct((ntiles, cout, 1), jnp.float32),
                       jax.ShapeDtypeStruct((ntiles, cout, 1), jnp.float32)),
            grid=(ntiles,), in_specs=in_specs,
            out_specs=(z_spec, stat_spec, stat_spec),
            compiler_params=cparams,
        )(patches_t, w2d_t, bias)
        mean = jnp.sum(ssum, axis=0)[:, 0] / M
        ex2 = jnp.sum(ssq, axis=0)[:, 0] / M
        var = jnp.maximum(ex2 - mean * mean, 0.0)
        scale = gamma.astype(jnp.float32) * jax.lax.rsqrt(var + BN_EPS)
        shift = beta.astype(jnp.float32) - mean * scale
    else:
        z = pl.pallas_call(
            functools.partial(_conv_tile_kernel, False),
            out_shape=jax.ShapeDtypeStruct((cout, M), z_dtype),
            grid=(ntiles,), in_specs=in_specs, out_specs=z_spec,
            compiler_params=cparams,
        )(patches_t, w2d_t, bias)
        if not needs_post:
            return z.reshape(cout, B, Ho, Wo)
        scale = jnp.ones((cout,), jnp.float32)
        shift = jnp.zeros((cout,), jnp.float32)

    inputs = [z, scale.reshape(cout, 1), shift.reshape(cout, 1)]
    p2_specs = [z_spec,
                pl.BlockSpec((cout, 1), lambda i: (0, 0)),
                pl.BlockSpec((cout, 1), lambda i: (0, 0))]
    if has_res:
        inputs.append(res)
        p2_specs.append(pl.BlockSpec((cout, tile), lambda i: (0, i)))
    y = pl.pallas_call(
        functools.partial(_affine_act_kernel, relu, has_res),
        out_shape=jax.ShapeDtypeStruct((cout, M), out_dtype),
        grid=(ntiles,), in_specs=p2_specs,
        out_specs=pl.BlockSpec((cout, tile), lambda i: (0, i)),
        compiler_params=cparams,
    )(*inputs)
    return y.reshape(cout, B, Ho, Wo)


# ----------------------------------------------------------------------------
# Pooling
# ----------------------------------------------------------------------------
def maxpool2d(x_cm, k=3, stride=2, pad=1):
    """MaxPool2d on (C, B, H, W); window slabs flattened to lane-dense (R, 128)."""
    C, B, H, W = x_cm.shape
    xp = jnp.pad(x_cm, ((0, 0), (0, 0), (pad, pad), (pad, pad)),
                 constant_values=-jnp.inf)              # MaxPool2d pads with -inf
    Ho = (H + 2 * pad - k) // stride + 1
    Wo = (W + 2 * pad - k) // stride + 1
    L = C * B * Ho * Wo
    cols = []
    for dh in range(k):
        for dw in range(k):
            cols.append(
                xp[:, :, dh:dh + Ho * stride:stride, dw:dw + Wo * stride:stride]
                .reshape(L))
    slab = jnp.stack(cols, axis=0)                      # (k*k, L)
    lp = ((L + 1023) // 1024) * 1024                    # (8,128)-aligned lane-dense pad
    slab = jnp.pad(slab, ((0, 0), (0, lp - L)))
    slab = slab.reshape(k * k, lp // 128, 128)
    out = pl.pallas_call(
        functools.partial(_maxpool_kernel, k * k),
        out_shape=jax.ShapeDtypeStruct((lp // 128, 128), x_cm.dtype),
        in_specs=_vmem_specs(1),
        out_specs=pl.BlockSpec(memory_space=pltpu.MemorySpace.VMEM),
        compiler_params=pltpu.CompilerParams(vmem_limit_bytes=VMEM_LIMIT),
    )(slab)
    return out.reshape(lp)[:L].reshape(C, B, Ho, Wo)


def global_avgpool_flatten(x_cm):
    """AdaptiveAvgPool2d((1,1)) + Flatten on (C, B, H, W) -> (B, C) float32."""
    C, B, H, W = x_cm.shape
    hw = H * W
    slab = jnp.transpose(x_cm.reshape(C, B, hw), (2, 1, 0))   # (HW, B, C)
    return pl.pallas_call(
        functools.partial(_avgpool_kernel, hw),
        out_shape=jax.ShapeDtypeStruct((B, C), jnp.float32),
        in_specs=_vmem_specs(1),
        out_specs=pl.BlockSpec(memory_space=pltpu.MemorySpace.VMEM),
        compiler_params=pltpu.CompilerParams(vmem_limit_bytes=VMEM_LIMIT),
    )(slab)


# ----------------------------------------------------------------------------
# Deterministic parameter construction (mirrors the nn.Module __init__ shapes)
# ----------------------------------------------------------------------------
def base_linspace_int(start, base, repeat):
    # TODO(synk): base_linspace_int is not defined in the reference file; assume the
    # usual geometric channel progression start * base**i for i in range(repeat).
    return [int(start * base ** i) for i in range(repeat)]


def conv_params(key, cin, cout, k):
    kw_key, kb_key = jax.random.split(key)
    bound = 1.0 / float((cin * k * k) ** 0.5)
    w = jax.random.uniform(kw_key, (cout, cin, k, k), jnp.float32, -bound, bound)
    b = jax.random.uniform(kb_key, (cout,), jnp.float32, -bound, bound)
    return w, b


def bn_params(key, c):
    g_key, b_key = jax.random.split(key)
    gamma = 1.0 + 0.1 * jax.random.normal(g_key, (c,), jnp.float32)
    beta = 0.1 * jax.random.normal(b_key, (c,), jnp.float32)
    return gamma, beta


def init_resblock(key, cin, cout, use_1x1=False, strides=1):
    keys = jax.random.split(key, 5)
    return {
        "conv1": conv_params(keys[0], cin, cout, 3),
        "bn1": bn_params(keys[1], cout),
        "conv2": conv_params(keys[2], cout, cout, 3),
        "bn2": bn_params(keys[3], cout),
        "conv3": conv_params(keys[4], cin, cout, 1) if use_1x1 else None,
        "strides": strides,
    }


def init_resnet_block(key, cin, cout, num_residuals, first_block=False):
    keys = jax.random.split(key, num_residuals)
    blocks = []
    for i in range(num_residuals):
        if i == 0 and not first_block:
            blocks.append(init_resblock(keys[i], cin, cout, use_1x1=True, strides=2))
        else:
            blocks.append(init_resblock(keys[i], cout, cout))
    return blocks


def init_resnet(key, start, repeat):
    channels_list = base_linspace_int(start, 2, repeat)
    n_stages = 1 + (len(channels_list) - 1)
    keys = jax.random.split(key, 2 + n_stages)
    params = {
        "stem_conv": conv_params(keys[0], 3, start, 7),
        "stem_bn": bn_params(keys[1], start),
        "stages": [init_resnet_block(keys[2], start, start, 2, first_block=True)],
    }
    for idx, (c_i, c_out) in enumerate(zip(channels_list[:-1], channels_list[1:])):
        params["stages"].append(init_resnet_block(keys[3 + idx], c_i, c_out, 2))
    return params


# ----------------------------------------------------------------------------
# Forward pass
# ----------------------------------------------------------------------------
def resblock_forward(x_cm, p):
    h = conv_bn_act(x_cm, *p["conv1"], *p["bn1"],
                    stride=p["strides"], pad=1, relu=True, use_bn=True)
    if p["conv3"] is not None:
        w3, b3 = p["conv3"]
        shortcut = conv_bn_act(x_cm, w3, b3, None, None,
                               stride=p["strides"], pad=0, relu=False, use_bn=False)
    else:
        shortcut = x_cm
    return conv_bn_act(h, *p["conv2"], *p["bn2"],
                       stride=1, pad=1, relu=True, use_bn=True, residual=shortcut)


def resnet_forward(params, x_nchw):
    # NCHW -> channel-major (C, B, H, W) bf16 activations (lane axis = B*H*W).
    x = jnp.transpose(x_nchw, (1, 0, 2, 3)).astype(jnp.bfloat16)
    # stem: Conv7x7 s2 p3 -> BN -> ReLU -> MaxPool3x3 s2 p1
    x = conv_bn_act(x, *params["stem_conv"], *params["stem_bn"],
                    stride=2, pad=3, relu=True, use_bn=True)
    x = maxpool2d(x, k=3, stride=2, pad=1)
    # trunk: residual stages -> AdaptiveAvgPool2d((1,1)) -> Flatten
    for stage in params["stages"]:
        for blk in stage:
            x = resblock_forward(x, blk)
    return global_avgpool_flatten(x)


if __name__ == "__main__":
    start, repeat = 8, 3
    key = jax.random.PRNGKey(0)
    pkey, xkey = jax.random.split(key)
    params = init_resnet(pkey, start, repeat)
    x = jax.random.normal(xkey, (2, 3, 32, 32), jnp.float32)      # NCHW, like PyTorch
    y = resnet_forward(params, x)
    y = jax.block_until_ready(y)
    assert y.shape == (2, start * 2 ** (repeat - 1)), y.shape
    assert bool(jnp.all(jnp.isfinite(y)))
    print("KERNEL_OK")
</pallas_src>

<mosaic_0001>
module attributes {stable_mosaic.version = 11 : i64} {
  func.func @_conv_tile_kernel(%arg0: i32, %arg1: memref<147x256xbf16, #tpu.memory_space<vmem>>, %arg2: memref<8x147xbf16, #tpu.memory_space<vmem>>, %arg3: memref<8x1xf32, #tpu.memory_space<vmem>>, %arg4: memref<8x256xf32, #tpu.memory_space<vmem>>, %arg5: memref<1x8x1xf32, #tpu.memory_space<vmem>>, %arg6: memref<1x8x1xf32, #tpu.memory_space<vmem>>) attributes {dimension_semantics = [#tpu.dimension_semantics<parallel>], iteration_bounds = array<i64: 2>, scalar_prefetch = 0 : i64, scratch_operands = 0 : i64, tpu.core_type = #tpu.core_type<tc>, window_params = [{transform_indices = @transform_0, window_bounds = array<i64: 147, 256>}, {pipeline_mode = #tpu.pipeline_mode<synchronous>, transform_indices = @transform_1, window_bounds = array<i64: 8, 147>}, {pipeline_mode = #tpu.pipeline_mode<synchronous>, transform_indices = @transform_2, window_bounds = array<i64: 8, 1>}, {transform_indices = @transform_3, window_bounds = array<i64: 8, 256>}, {transform_indices = @transform_4, window_bounds = array<i64: 1, 8, 1>}, {transform_indices = @transform_5, window_bounds = array<i64: 1, 8, 1>}]} {
    %c0 = arith.constant 0 : index
    %c0_0 = arith.constant 0 : index
    %0 = vector.load %arg2[%c0, %c0_0] : memref<8x147xbf16, #tpu.memory_space<vmem>>, vector<8x147xbf16>
    %c0_1 = arith.constant 0 : index
    %c0_2 = arith.constant 0 : index
    %1 = vector.load %arg1[%c0_1, %c0_2] : memref<147x256xbf16, #tpu.memory_space<vmem>>, vector<147x256xbf16>
    %cst = arith.constant dense<0.000000e+00> : vector<8x256xf32>
    %2 = tpu.matmul %0, %1, %cst {dimension_numbers = #tpu.dot_dimension_numbers<[1], [0], [0], [1], [0, 0, 1, 1], [], []>} : vector<8x147xbf16>, vector<147x256xbf16>, vector<8x256xf32> -> vector<8x256xf32>
    %c0_3 = arith.constant 0 : index
    %c0_4 = arith.constant 0 : index
    %3 = vector.load %arg3[%c0_3, %c0_4] : memref<8x1xf32, #tpu.memory_space<vmem>>, vector<8x1xf32>
    %4 = vector.broadcast %3 : vector<8x1xf32> to vector<8x256xf32>
    %5 = arith.addf %2, %4 : vector<8x256xf32>
    %c0_5 = arith.constant 0 : index
    %c0_6 = arith.constant 0 : index
    %6 = vector.load %arg4[%c0_5, %c0_6] : memref<8x256xf32, #tpu.memory_space<vmem>>, vector<8x256xf32>
    tpu.vector_store %arg4[%c0_5, %c0_6], %5 {strides = array<i32>} : memref<8x256xf32, #tpu.memory_space<vmem>>, vector<8x256xf32>,
    %cst_7 = arith.constant dense<0.000000e+00> : vector<8xf32>
    %7 = vector.multi_reduction <add>, %5, %cst_7 [1] : vector<8x256xf32> to vector<8xf32>
    %8 = vector.shape_cast %7 : vector<8xf32> to vector<8x1xf32>
    %9 = vector.shape_cast %8 : vector<8x1xf32> to vector<1x8x1xf32>
    %c0_8 = arith.constant 0 : index
    %c0_9 = arith.constant 0 : index
    %c0_10 = arith.constant 0 : index
    %10 = vector.load %arg5[%c0_8, %c0_9, %c0_10] : memref<1x8x1xf32, #tpu.memory_space<vmem>>, vector<1x8x1xf32>
    tpu.vector_store %arg5[%c0_8, %c0_9, %c0_10], %9 {strides = array<i32>} : memref<1x8x1xf32, #tpu.memory_space<vmem>>, vector<1x8x1xf32>,
    %11 = arith.mulf %5, %5 : vector<8x256xf32>
    %cst_11 = arith.constant dense<0.000000e+00> : vector<8xf32>
    %12 = vector.multi_reduction <add>, %11, %cst_11 [1] : vector<8x256xf32> to vector<8xf32>
    %13 = vector.shape_cast %12 : vector<8xf32> to vector<8x1xf32>
    %14 = vector.shape_cast %13 : vector<8x1xf32> to vector<1x8x1xf32>
    %c0_12 = arith.constant 0 : index
    %c0_13 = arith.constant 0 : index
    %c0_14 = arith.constant 0 : index
    %15 = vector.load %arg6[%c0_12, %c0_13, %c0_14] : memref<1x8x1xf32, #tpu.memory_space<vmem>>, vector<1x8x1xf32>
    tpu.vector_store %arg6[%c0_12, %c0_13, %c0_14], %14 {strides = array<i32>} : memref<1x8x1xf32, #tpu.memory_space<vmem>>, vector<1x8x1xf32>,
    return
  }
  func.func @transform_0(%arg0: i32) -> (i32, i32) {
    %c0_i32 = arith.constant 0 : i32
    %c0_i32_0 = arith.constant 0 : i32
    return %c0_i32, %arg0 : i32, i32
  }
  func.func @transform_1(%arg0: i32) -> (i32, i32) {
    %c0_i32 = arith.constant 0 : i32
    %c0_i32_0 = arith.constant 0 : i32
    %c0_i32_1 = arith.constant 0 : i32
    return %c0_i32, %c0_i32_0 : i32, i32
  }
  func.func @transform_2(%arg0: i32) -> (i32, i32) {
    %c0_i32 = arith.constant 0 : i32
    %c0_i32_0 = arith.constant 0 : i32
    %c0_i32_1 = arith.constant 0 : i32
    return %c0_i32, %c0_i32_0 : i32, i32
  }
  func.func @transform_3(%arg0: i32) -> (i32, i32) {
    %c0_i32 = arith.constant 0 : i32
    %c0_i32_0 = arith.constant 0 : i32
    return %c0_i32, %arg0 : i32, i32
  }
  func.func @transform_4(%arg0: i32) -> (i32, i32, i32) {
    %c0_i32 = arith.constant 0 : i32
    %c0_i32_0 = arith.constant 0 : i32
    %c0_i32_1 = arith.constant 0 : i32
    return %arg0, %c0_i32, %c0_i32_0 : i32, i32, i32
  }
  func.func @transform_5(%arg0: i32) -> (i32, i32, i32) {
    %c0_i32 = arith.constant 0 : i32
    %c0_i32_0 = arith.constant 0 : i32
    %c0_i32_1 = arith.constant 0 : i32
    return %arg0, %c0_i32, %c0_i32_0 : i32, i32, i32
  }
}

</mosaic_0001>

<bundles_post_ra>
// kernel: tpu_custom_call.1
= control target key start
LH: loop header
LB: loop body
LE: loop exit
PB: predicated region body
PF: predicated region fallthrough
CT: control target
= control target key end

     0   :  { %11 = vsyncpa [#allocation3], 0  ;;  %s1036_s0 = inlined_call_operand.hbm [shape: bf16[147,512], index: 0, kind: input, shape index: {}]   ;;  %s1037_s1 = inlined_call_operand.vmem [shape: bf16[8,147], index: 1, kind: input, shape index: {}]   ;;  %s1038_s2 = inlined_call_operand.vmem [shape: f32[8,1], index: 2, kind: input, shape index: {}]   ;;  %s1039_s3 = inlined_call_operand.hbm [shape: f32[8,512], index: 3, kind: output, shape index: {0}]   ;;  %s1040_s4 = inlined_call_operand.vmem [shape: f32[2,8,1], index: 4, kind: output, shape index: {1}]   ;;  %s1041_s5 = inlined_call_operand.vmem [shape: f32[2,8,1], index: 5, kind: output, shape index: {2}]  }
   0x1   :  { %13 = vsyncpa [#allocation3 + $0x1], 0 }
   0x2   :  { %14 = vsyncpa [#allocation4], 0 }
   0x3   :  { %16 = vsyncpa [#allocation4 + $0x1], 0  ;;  %s864_s18 = smov 0   ;;  %s866_s19 = smov 0  }
   0x4   :  { %s868_s20 = smov 0   ;;  %s870_s21 = smov 0  }
   0x5 LB: > { %s885_s22 = sadd.s32 4294967295, %s825_s21   ;;  %s609_s23 = sadd.s32 4294967294, %s825_s21   ;;  %s825_s21 = sphi %s870_s21, %s1056_s21   ;;  %s821_s20 = sphi %s868_s20, %s1055_s20   ;;  %s817_s19 = sphi %s866_s19, %s1054_s19   ;;  %s813_s18 = sphi %s864_s18, %s1053_s18  }
   0x6   : > { %s889_s24 = sadd.s32 1, %s825_s21   ;;  %s29_s25 = sadd.s32 1, %s821_s20 }
   0x7   : > { %s26_s26 = ssub.s32 %s825_s21, %s889_s24  ;;  %p36_p0 = scmp.ne.s32.totalorder %s821_s20, %s817_s19 }
   0x8   : > { %p27_p1 = scmp.eq.s32.totalorder %s26_s26, 0  ;;  %p37_p2 = scmp.eq.s32.totalorder %s825_s21, 0 }
   0x9   : > { %p42_p3 = scmp.ne.s32.totalorder %s817_s19, %s813_s18  ;;  %p43_p4 = scmp.eq.s32.totalorder %s885_s22, 0 }
   0xa   : > { %s901_s27 = scalar_select %p27_p1, %s821_s20, %s29_s25  }
   0xb   : > { %p38_p5 = por %p37_p2, %p36_p0  ;;  %p903_p6 = por %p43_p4, %p42_p3 }
   0xc   : > { %p108_p7 = scmp.eq.s32.totalorder %s885_s22, 1  ;;  %p114_p8 = scmp.eq.s32.totalorder %s609_s23, 1 }
   0xd   : > { %s1044_s28 = scalar_select %p903_p6, 1, 0 }
   0xe   : > { %p662_p10 = scmp.lt.s32.totalorder %s825_s21, 2  ;;  %p910_p11 = por %p108_p7, %p36_p0 }
   0xf   : > { %p914_p12 = por %p114_p8, %p42_p3  ;;  %s192_s6 = sand.u32 1, %s821_s20  }
  0x10   : > { %s1045_s29 = scalar_select %p910_p11, 1, 0 }
  0x11   : > { %s1046_s30 = scalar_select %p914_p12, 1, 0 }
  0x12   : > { %s646_s7 = sshll.u32 %s825_s21, 7  ;;  %s648_s8 = smul.u32 152, %s192_s6 }
  0x13   : > { %s923_s11 = scalar_lea.hbm %s1036_s0, %s646_s7  ;;  %p925_p13 = pnand %p662_p10, %p38_p5 }
  0x14   : > { %s196_s13 = scalar_lea.vmem [#allocation2], %s648_s8  ;;  %s932_s15 = scalar_lea.sflag [#allocation3], %s192_s6 }
  0x15   : > { %s203_s14 = sshll.u32 %s196_s13, 4  ;;  %s733_s16 = scalar_lea.hbm %s923_s11, 2432  ;;  %s929_s14 = int_to_ptr.vmem [resolvable:$true] %s203_s14 }
  0x16   : > { %p734_p1 = scmp.ne.s32.totalorder %s923_s11, %s733_s16  ;;  %p735_p2 = pneg %p925_p13 }
  0x17   : > { %s738_s25 = scalar_lea.hbm %s1036_s0, 4864  ;;  %p739_p5 = scmp.lt.s32.totalorder %s923_s11, %s1036_s0 }
  0x18   : > { %p736_p3 = pnand %p735_p2, %p734_p1  ;;  %p740_p7 = scmp.lt.s32.totalorder %s738_s25, %s733_s16 }
  0x1a   : > { %p737_p4 = pneg %p736_p3  ;;  %p741_p8 = por %p740_p7, %p739_p5 }
  0x1c   : > { %p742_p10 = pnand %p741_p8, %p737_p4 }
  0x1e   : > { %745 = shalt.err (!%p742_p10)
}
  0x1f   : > { %s746_s6 = scalar_lea.vmem %s929_s14, 2432  ;;  %s827_s8 = smov [#allocation2]  }
  0x20   : > { %p747_p9 = scmp.ne.s32.totalorder %s929_s14, %s746_s6  ;;  %s751_s9 = sshll.u32 %s827_s8, 4  ;;  %s752_s9 = int_to_ptr.vmem [resolvable:$false] %s751_s9 }
  0x21   : > { %s753_s10 = scalar_lea.vmem %s752_s9, 4864  ;;  %p754_p3 = scmp.lt.s32.totalorder %s929_s14, %s752_s9 }
  0x22   : > { %p749_p0 = pnand %p747_p9, %p735_p2  ;;  %p755_p12 = scmp.lt.s32.totalorder %s753_s10, %s746_s6 }
  0x24   : > { %p750_p1 = pneg %p749_p0  ;;  %p756_p11 = por %p755_p12, %p754_p3 }
  0x26   : > { %p757_p6 = pnand %p756_p11, %p750_p1 }
  0x28   : > { %760 = shalt.err (!%p757_p6)
}
  0x29   : > { %s828_s13 = smov 256   ;;  %s829_s16 = smov 128  }
  0x2a   : > { %s830_s17 = smov 8   ;;  %p211_p9 = scmp.lt.s32.totalorder %s825_s21, 3 }
  0x2b   : > { %657 = dma.hbm_to_vmem [thread:$0]  (!%p925_p13), %s923_s11, 2432, %s929_s14, %s932_s15, %s828_s13, %s829_s16, %s830_s17  }
  0x2c   : > { %p1048_p0 = scmp.ge.s32.totalorder %s825_s21, 1 }
  0x2e   : > { %p212_p2 = pnand %p1048_p0, %p211_p9 }
  0x2f   : > { %s957_s23 = sand.u32 (!%p212_p2), 1, %s817_s19   ;;  %p1049_p6 = scmp.ne.s32.totalorder (!%p212_p2), %s1044_s28, 0 }
  0x30   : > { %215 = sbr.rel (%p212_p2) target bundleno = 435 (0x1b3), region = 32  ;;  %s218_s26 = scalar_lea.sflag (!%p212_p2), [#allocation3], %s957_s23 }
  0x31   : > { %s649_s25 = smul.u32 (!%p212_p2), 152, %s957_s23 }
  0x33   : > { %s961_s7 = scalar_lea.vmem (!%p212_p2), [#allocation2], %s649_s25 }
  0x35   : > { %804 = dma.done.wait (%p1049_p6), %s218_s26, 2432  }
  0x36   : > { %806 = vsyncadd (%p1049_p6), %s218_s26, 4294964864  ;;  %v831_v0 = vmov 0   ;;  %v702_v1 = vld [vmem:[%s961_s7 + $0x74] ss:$8 sps:$4 sm:$0xff]   ;;  %v704_v2 = vld [vmem:[%s961_s7 + $0x70] ss:$8 sps:$4 sm:$0xff]  }
  0x37   : > { %701 = vset.pattern.permute.xlu0 %v831_v0  ;;  %408 = vmatprep.subr.bf16.mxu0 %v702_v1  ;;  %v705_v3 = vld [vmem:[%s961_s7 + $0x64] ss:$8 sps:$4 sm:$0xff]   ;;  %v707_v4 = vld [vmem:[%s961_s7 + $0x60] ss:$8 sps:$4 sm:$0xff]   ;;  %v708_v5 = vld [vmem:[%s961_s7 + $0x54] ss:$8 sps:$4 sm:$0xff]  }
  0x38   : > { %409 = vmatpush1.bf16.msra.mxu0 %v704_v2  ;;  %v710_v6 = vld [vmem:[%s961_s7 + $0x50] ss:$8 sps:$4 sm:$0xff]   ;;  %v711_v7 = vld [vmem:[%s961_s7 + $0x44] ss:$8 sps:$4 sm:$0xff]   ;;  %v713_v8 = vld [vmem:[%s961_s7 + $0x40] ss:$8 sps:$4 sm:$0xff]  }
  0x39   : > { %410 = vmatprep.subr.bf16.mxu0 %v705_v3  ;;  %v714_v9 = vld [vmem:[%s961_s7 + $0x34] ss:$8 sps:$4 sm:$0xff]   ;;  %v267_v10 = vld [vmem:[%s1037_s1] sm:$0xff]  ;;  %vm394_vm0 = vcmask 154624   ;;  %v716_v13 = vld [vmem:[%s961_s7 + $0x30] ss:$8 sps:$4 sm:$0xff]  }
  0x3a   : > { %v287_v11 = vld [vmem:[%s1038_s2] sm:$0xff]  ;;  %v619_v12 = vcombine.high %v267_v10, %v267_v10  ;;  %vm398_vm1 = vcmask 1040384   ;;  %v720_v16 = vld [vmem:[%s961_s7 + $0x14] ss:$8 sps:$4 sm:$0xff]   ;;  %vm399_vm2 = vcmask 1041408   ;;  %v832_v18 = vmov 65535  }
  0x3b   : > { %290 = vperm.xlu0 %701, %v287_v11   ;;  %v717_v14 = vld [vmem:[%s961_s7 + $0x24] ss:$8 sps:$4 sm:$0xff]   ;;  %v719_v15 = vld [vmem:[%s961_s7 + $0x20] ss:$8 sps:$4 sm:$0xff]   ;;  %v286_v17 = vld [vmem:[%s961_s7 + $0x90] sm:$0x33]  ;;  %v618_v30 = vcombine.low %v267_v10, %v267_v10 }
  0x3c   : > { %411 = vmatpush1.bf16.msra.mxu0 %v707_v4  ;;  %640 = vmatprep.mubr.msk.bf16.mxu0 %vm394_vm0, %v619_v12  ;;  %v400_v19 = vsel %vm398_vm1, 4294967295, %v832_v18  ;;  %v722_v20 = vld [vmem:[%s961_s7 + $0x10] ss:$8 sps:$4 sm:$0xff]   ;;  %v723_v21 = vld [vmem:[%s961_s7 + $0x4] ss:$8 sps:$4 sm:$0xff]   ;;  %v639_v22 = vcombine.high %v286_v17, %v286_v17  ;;  %v638_v25 = vcombine.low %v286_v17, %v286_v17  ;;  %s615_s15 = sshll.u32 %s957_s23, 4 }
  0x3d   : > { %412 = vmatprep.subr.bf16.mxu0 %v708_v5  ;;  %v401_v23 = vsel %vm399_vm2, %v400_v19, 0  ;;  %v725_v24 = vld [vmem:[%s961_s7] ss:$8 sps:$4 sm:$0xff]   ;;  %v728_v28 = vld [vmem:[%s961_s7 + $0x84] ss:$8 sps:$4 sm:$0xff]   ;;  %s243_s6 = scalar_lea.vmem [#allocation5], %s615_s15 }
  0x3e   : > { %v406_v26 = vand.u32 %v639_v22, %v401_v23  ;;  %v403_v27 = vand.u32 %v638_v25, %v401_v23  ;;  %v730_v29 = vld [vmem:[%s961_s7 + $0x80] ss:$8 sps:$4 sm:$0xff]   ;;  %s647_s8 = sshll.u32 %s885_s22, 8  ;;  %s485_s16 = sshll.u32 %s243_s6, 4  ;;  %s486_s16 = int_to_ptr.vmem [resolvable:$true] %s485_s16 }
  0x3f   : > { %s483_s13 = scalar_lea.hbm %s1039_s3, %s647_s8  ;;  %s463_s17 = scalar_lea.sflag [#allocation4], %s957_s23 }
  0x40   : > { %413 = vmatpush1.bf16.msra.mxu0 %v710_v6  ;;  %s761_s25 = scalar_lea.vmem %s486_s16, 256  ;;  %p1050_p12 = scmp.ne.s32.totalorder %s1045_s29, 0 }
  0x41   : > { %414 = vmatprep.subr.bf16.mxu0 %v711_v7  ;;  %p762_p11 = scmp.ne.s32.totalorder %s486_s16, %s761_s25  ;;  %s833_s26 = smov [#allocation5]  }
  0x42   : > { %s765_s7 = sshll.u32 %s833_s26, 4  ;;  %s766_s7 = int_to_ptr.vmem [resolvable:$false] %s765_s7 }
  0x43   : > { %p763_p13 = pnand %p762_p11, %p1050_p12  ;;  %s767_s28 = scalar_lea.vmem %s766_s7, 512 }
  0x44   : > { %415 = vmatpush1.bf16.msra.mxu0 %v713_v8  ;;  %p768_p5 = scmp.lt.s32.totalorder %s486_s16, %s766_s7  ;;  %p769_p7 = scmp.lt.s32.totalorder %s767_s28, %s761_s25 }
  0x45   : > { %416 = vmatprep.subr.bf16.mxu0 %v714_v9  ;;  %p764_p4 = pneg %p763_p13 }
  0x46   : > { %p770_p8 = por %p769_p7, %p768_p5 }
  0x48   : > { %417 = vmatpush1.bf16.msra.mxu0 %v716_v13  ;;  %p771_p10 = pnand %p770_p8, %p764_p4 }
  0x49   : > { %418 = vmatprep.subr.bf16.mxu0 %v717_v14 }
  0x4c   : > { %419 = vmatpush1.bf16.msra.mxu0 %v719_v15 }
  0x4d   : > { %420 = vmatprep.subr.bf16.mxu0 %v720_v16 }
  0x50   : > { %421 = vmatpush1.bf16.msra.mxu0 %v722_v20 }
  0x51   : > { %422 = vmatprep.subr.bf16.mxu0 %v723_v21 }
  0x54   : > { %423 = vmatpush1.bf16.msra.mxu0 %v725_v24 }
  0x55   : > { %436 = vmatprep.subr.bf16.mxu0 %v406_v26 }
  0x58   : > { %437 = vmatpush2.bf16.msra.mxu0 %v403_v27 }
  0x59   : > { %438 = vmatprep.subr.bf16.mxu0 %v728_v28 }
  0x5c   : > { %439 = vmatpush2.bf16.msra.mxu0 %v730_v29 }
  0x5f   : > { %441 = vmatmul.mubr.bf16.vlgmr.msra.gmra.mxu0 %v618_v30 }
  0xb6   : > { %v291_v31 = vpop.permute.xlu0 %290 }
 0x11f   : > { %v442_v32 = vpop.f32.mrf.mxu0 }
 0x120   : > { %v443_v33 = vadd.f32 %v442_v32, %v291_v31 }
 0x121   : > { %v444_v34 = vpop.f32.mrf.mxu0 }
 0x122   : > { %449 = vst [vmem:[%s243_s6] sm:$0xff] %v443_v33  ;;  %v445_v35 = vadd.f32 %v444_v34, %v291_v31  ;;  %v456_v38 = vmul.f32 %v443_v33, %v443_v33 }
 0x123   : > { %v446_v36 = vpop.f32.mrf.mxu0 }
 0x124   : > { %450 = vst [vmem:[%s243_s6 + $0x8] sm:$0xff] %v445_v35  ;;  %v451_v37 = vadd.f32 %v445_v35, %v443_v33  ;;  %v457_v39 = vmul.f32 %v445_v35, %v445_v35 }
 0x125   : > { %v447_v40 = vpop.f32.mrf.mxu0 }
 0x126   : > { %452 = vadd.xlane.f32.xlu0 %v451_v37  ;;  %v458_v41 = vadd.f32 %v457_v39, %v456_v38 }
 0x128   : > { %459 = vadd.xlane.f32.xlu1 %v458_v41 }
 0x129   : > { %774 = shalt.err (!%p771_p10)
}
 0x12a   : > { %s775_s11 = scalar_lea.hbm %s483_s13, 256  ;;  %s779_s14 = scalar_lea.hbm %s1039_s3, 512 }
 0x12b   : > { %p776_p1 = scmp.ne.s32.totalorder %s483_s13, %s775_s11  ;;  %p780_p0 = scmp.lt.s32.totalorder %s483_s13, %s1039_s3 }
 0x12c   : > { %p781_p2 = scmp.lt.s32.totalorder %s779_s14, %s775_s11 }
 0x12d   : > { %p777_p3 = pnand %p776_p1, %p1050_p12 }
 0x12e   : > { %p782_p6 = por %p781_p2, %p780_p0 }
 0x12f   : > { %p778_p9 = pneg %p777_p3 }
 0x131   : > { %p783_p11 = pnand %p782_p6, %p778_p9 }
 0x133   : > { %786 = shalt.err (!%p783_p11)
}
 0x134   : > { %652 = dma.vmem_to_hbm [thread:$0]  (%p1050_p12), %s486_s16, 256, %s483_s13, %s463_s17   ;;  %vm454_vm3 = vcmask 7168  }
 0x135   : > { %p258_p13 = scmp.lt.s32.totalorder %s885_s22, 1 }
 0x137   : > { %s1058_s22 = smov (!%p258_p13, %s885_s22), 1 }
 0x138   : > { %s616_s8 = sshll.u32 %s1058_s22, 3 }
 0x139   : > { %s261_s25 = scalar_lea.vmem %s1040_s4, %s616_s8  ;;  %s265_s28 = scalar_lea.vmem %s1041_s5, %s616_s8 }
 0x1af   : > { %v453_v42 = vpop.xlane.xlu0 %452 }
 0x1b0   : > { %455 = vst.msk [vmem:[%s261_s25] sm:$0xff] %vm454_vm3, %v453_v42 }
 0x1b1   : > { %v460_v43 = vpop.xlane.xlu1 %459 }
 0x1b2   : > { %461 = vst.msk [vmem:[%s265_s28] sm:$0xff] %vm454_vm3, %v460_v43 }
 0x1b3 PF: > { %s503_s29 = sand.u32 1, %s813_s18   ;;  %p1051_p12 = scmp.ne.s32.totalorder %s1046_s30, 0 }
 0x1b4   : > { %p1052_p4 = scmp.ge.s32.totalorder %s825_s21, 2  ;;  %s504_s22 = scalar_lea.sflag [#allocation4], %s503_s29 }
 0x1b6   : > { %p659_p5 = pnand %p1052_p4, %p1051_p12 }
 0x1b8   : > { %p660_p7 = pneg %p659_p5 }
 0x1ba   : > { %808 = dma.done.wait (%p660_p7), %s504_s22, 256  }
 0x1bb   : > { %810 = vsyncadd (%p660_p7), %s504_s22, 4294967040  ;;  %p19_p8 = scmp.ge.s32.totalorder %s889_s24, 4   ;;  %s1053_s18 = smov %s817_s19 }
 0x1bc   : > { %s1054_s19 = smov %s821_s20  ;;  %s1055_s20 = smov %s901_s27 }
 0x1bd   : > { %s1056_s21 = smov %s889_s24  ;;  %21 = sbr.rel (!%p19_p8) target bundleno = 5 (0x5), region = 101 }
 0x1c2   :  { %523 = vsyncpa [#allocation3], 1 }
 0x1c3   :  { %525 = vsyncpa [#allocation3 + $0x1], 1 }
 0x1c4   :  { %526 = vsyncpa [#allocation4], 1 }
 0x1c5   :  { %528 = vsyncpa [#allocation4 + $0x1], 1 }

</bundles_post_ra>
